<compile_context>
chip_gen: v6e
topology: v6e:2x2x1
jax: 0.10.0
libtpu: 0.0.40
codegen_flags: <defaults>
</compile_context>

<pallas_src>
import functools

import jax
import jax.numpy as jnp
from jax.experimental import pallas as pl
from jax.experimental.pallas import tpu as pltpu

NEG_SLOPE = 0.2


def gat_kernel(h_ref, adj_ref, w_ref, aproj_ref, bias_ref,
               out_ref, attn_ref, hp_scratch, u_scratch, *, n_head, f_out):
    q = pl.program_id(1)
    tq = out_ref.shape[1]

    # Per-batch work done once (q == 0): fused-head projection and the
    # attention-score projection, both on the MXU, persisted in VMEM scratch.
    @pl.when(q == 0)
    def _project():
        hp = jnp.dot(h_ref[0], w_ref[...],
                     preferred_element_type=jnp.float32)        # (n, H*f_out)
        hp_scratch[...] = hp
        u_scratch[...] = jnp.dot(jnp.tanh(hp), aproj_ref[...],
                                 preferred_element_type=jnp.float32)  # (n, 2H)

    hp_all = hp_scratch[...]                       # (n, H*f_out)
    u_all = u_scratch[...]                         # (n, 2H)
    row0 = pl.multiple_of(q * tq, tq)
    u_q = u_scratch[pl.ds(row0, tq), :]            # (tq, 2H) -- this q-tile's rows
    adj = adj_ref[0]                               # (tq, n)
    bias = bias_ref[0]                             # (H*f_out,)

    neg_inf = jnp.float32(-jnp.inf)
    out_cols = []
    for hd in range(n_head):                       # unrolled: n_head is small
        src = u_q[:, hd:hd + 1]                                        # (tq, 1)
        dst = jnp.transpose(u_all[:, n_head + hd:n_head + hd + 1])     # (1, n)

        logits = src + dst                                             # (tq, n)
        logits = jnp.maximum(logits, NEG_SLOPE * logits)               # LeakyReLU(0.2)
        # masked_fill where adj == 0 (matches PyTorch; all-masked rows -> NaN)
        logits = jnp.where(adj > 0, logits, neg_inf)

        # row softmax
        m = jnp.max(logits, axis=-1, keepdims=True)
        e = jnp.exp(logits - m)
        s = jnp.sum(e, axis=-1, keepdims=True)
        attn = e * pl.reciprocal(s, approx=True)

        attn_ref[0, hd] = attn.astype(attn_ref.dtype)

        # Aggregation on the MXU with bf16 inputs, f32 accumulate.
        hp_h = hp_all[:, hd * f_out:(hd + 1) * f_out]                  # (n, f_out)
        o = jnp.dot(attn.astype(jnp.bfloat16), hp_h.astype(jnp.bfloat16),
                    preferred_element_type=jnp.float32)                # (tq, f_out)
        out_cols.append(o)

    # Single lane-dense store of the main output (tq, H*f_out).
    out_all = jnp.concatenate(out_cols, axis=-1) + bias[None, :]
    out_ref[0] = out_all.astype(out_ref.dtype)


def _pick_tq(n):
    if n <= 512:
        return n
    for cand in (512, 256, 128):
        if n % cand == 0:
            return cand
    return n


def batch_multi_head_graph_attention(h, adj, w, a_src, a_dst, bias):
    bs, n, f_in = h.shape
    n_head, _, f_out = w.shape
    f_tot = n_head * f_out

    # Fuse heads into the lane dim of the projection weight: (f_in, H*f_out).
    w_all = jnp.transpose(w, (1, 0, 2)).reshape(f_in, f_tot)

    # Block-diagonal [a_src | a_dst] so attn_src/attn_dst for ALL heads come
    # from one MXU matmul: (H*f_out, 2H).
    eye_h = jnp.eye(n_head, dtype=w.dtype)
    a_src_bd = (a_src.reshape(n_head, f_out, 1) * eye_h[:, None, :]).reshape(f_tot, n_head)
    a_dst_bd = (a_dst.reshape(n_head, f_out, 1) * eye_h[:, None, :]).reshape(f_tot, n_head)
    a_proj = jnp.concatenate([a_src_bd, a_dst_bd], axis=1)     # (H*f_out, 2H)

    bias_all = jnp.tile(bias.reshape(-1), n_head).reshape(1, f_tot)

    tq = _pick_tq(n)
    nq = n // tq
    grid = (bs, nq)

    out_shapes = (
        jax.ShapeDtypeStruct((bs, n, f_tot), jnp.float32),      # lane-dense output
        jax.ShapeDtypeStruct((bs, n_head, n, n), jnp.float32),  # attention weights
    )

    in_specs = [
        pl.BlockSpec((1, n, f_in), lambda b, q: (b, 0, 0)),       # h (full, reused over q)
        pl.BlockSpec((1, tq, n), lambda b, q: (b, q, 0)),         # adj (q-tiled rows)
        pl.BlockSpec((f_in, f_tot), lambda b, q: (0, 0)),         # fused w
        pl.BlockSpec((f_tot, 2 * n_head), lambda b, q: (0, 0)),   # [a_src|a_dst] blockdiag
        pl.BlockSpec((1, f_tot), lambda b, q: (0, 0)),            # tiled bias
    ]
    out_specs = (
        pl.BlockSpec((1, tq, f_tot), lambda b, q: (b, q, 0)),
        pl.BlockSpec((1, n_head, tq, n), lambda b, q: (b, 0, q, 0)),
    )
    scratch_shapes = [
        pltpu.VMEM((n, f_tot), jnp.float32),        # h_prime for all heads / all rows
        pltpu.VMEM((n, 2 * n_head), jnp.float32),   # attn_src / attn_dst scores
    ]

    # Size the scoped VMEM limit to the actual double-buffered working set.
    fl = 4
    working_set = fl * (
        2 * n * f_in + 2 * tq * n + 2 * tq * f_tot + 2 * n_head * tq * n
        + n * f_tot + n * 2 * n_head + f_in * f_tot + f_tot * 2 * n_head + f_tot
    )
    vmem_limit = max(32 << 20, min(int(1.5 * working_set) + (2 << 20), 100 << 20))

    kernel = functools.partial(gat_kernel, n_head=n_head, f_out=f_out)

    out_all, attn = pl.pallas_call(
        kernel,
        out_shape=out_shapes,
        grid_spec=pltpu.PrefetchScalarGridSpec(
            num_scalar_prefetch=0,
            grid=grid,
            in_specs=in_specs,
            out_specs=out_specs,
            scratch_shapes=scratch_shapes,
        ),
        compiler_params=pltpu.CompilerParams(
            # Megacore split on the batch axis; q carries VMEM scratch -> arbitrary.
            dimension_semantics=("parallel", "arbitrary"),
            vmem_limit_bytes=vmem_limit,
        ),
    )(h, adj, w_all, a_proj, bias_all)

    # Layout plumbing back to the PyTorch output shape (bs, n_head, n, f_out).
    out = out_all.reshape(bs, n, n_head, f_out).transpose(0, 2, 1, 3)
    return out, attn


def reference_gat(h, adj, w, a_src, a_dst, bias):
    """Pure-JAX reference matching the PyTorch forward exactly (f32)."""
    h_prime = jnp.einsum('bnf,hfo->bhno', h, w)                       # (bs,H,n,f_out)
    t = jnp.tanh(h_prime)
    attn_src = jnp.einsum('bhno,hoi->bhni', t, a_src)                 # (bs,H,n,1)
    attn_dst = jnp.einsum('bhno,hoi->bhni', t, a_dst)                 # (bs,H,n,1)
    attn = attn_src + jnp.swapaxes(attn_dst, -1, -2)                  # (bs,H,n,n)
    attn = jnp.where(attn >= 0, attn, NEG_SLOPE * attn)
    attn = jnp.where(adj[:, None, :, :] > 0, attn, -jnp.inf)
    attn = jax.nn.softmax(attn, axis=-1)
    out = jnp.einsum('bhnm,bhmo->bhno', attn, h_prime) + bias
    return out, attn


if __name__ == "__main__":
    key = jax.random.PRNGKey(0)
    bs, n, f_in, f_out, n_head = 2, 8, 16, 32, 4

    k1, k2, k3, k4, k5 = jax.random.split(key, 5)

    def xavier(k, shape, fan_in, fan_out):
        limit = (6.0 / (fan_in + fan_out)) ** 0.5
        return jax.random.uniform(k, shape, jnp.float32, -limit, limit)

    w = xavier(k1, (n_head, f_in, f_out), f_in, f_out)
    a_src = xavier(k2, (n_head, f_out, 1), f_out, 1)
    a_dst = xavier(k3, (n_head, f_out, 1), f_out, 1)
    bias = jnp.zeros((f_out,), jnp.float32)   # init.constant_(bias, 0)

    h = jax.random.normal(k4, (bs, n, f_in), jnp.float32)

    # Random 0/1 adjacency with self-loops (avoids all-masked rows -> NaN).
    adj_raw = (jax.random.uniform(k5, (bs, n, n)) > 0.5).astype(jnp.float32)
    eye = jnp.eye(n, dtype=jnp.float32)[None]
    adj = jnp.clip(adj_raw + eye, 0.0, 1.0)

    out, attn = batch_multi_head_graph_attention(h, adj, w, a_src, a_dst, bias)
    out = jax.block_until_ready(out)
    attn = jax.block_until_ready(attn)

    out_ref, attn_ref = reference_gat(h, adj, w, a_src, a_dst, bias)

    assert out.shape == (bs, n_head, n, f_out)
    assert attn.shape == (bs, n_head, n, n)
    # Tolerances relaxed for the bf16 aggregation matmul and the EUP
    # approximate reciprocal in the softmax normalization (per perf review).
    assert jnp.allclose(attn, attn_ref, atol=1e-2, rtol=1e-2)
    assert jnp.allclose(out, out_ref, atol=5e-2, rtol=5e-2)

    print("KERNEL_OK")
</pallas_src>

<mosaic_0001>
module attributes {stable_mosaic.version = 11 : i64} {
  func.func @gat_kernel(%arg0: i32, %arg1: i32, %arg2: memref<1x8x16xf32, #tpu.memory_space<vmem>>, %arg3: memref<1x8x8xf32, #tpu.memory_space<vmem>>, %arg4: memref<16x128xf32, #tpu.memory_space<vmem>>, %arg5: memref<128x8xf32, #tpu.memory_space<vmem>>, %arg6: memref<1x128xf32, #tpu.memory_space<vmem>>, %arg7: memref<1x8x128xf32, #tpu.memory_space<vmem>>, %arg8: memref<1x4x8x8xf32, #tpu.memory_space<vmem>>, %arg9: memref<8x128xf32, #tpu.memory_space<vmem>>, %arg10: memref<8x8xf32, #tpu.memory_space<vmem>>) attributes {dimension_semantics = [#tpu.dimension_semantics<parallel>, #tpu.dimension_semantics<arbitrary>], iteration_bounds = array<i64: 2, 1>, scalar_prefetch = 0 : i64, scratch_operands = 2 : i64, tpu.core_type = #tpu.core_type<tc>, window_params = [{transform_indices = @transform_0, window_bounds = array<i64: 1, 8, 16>}, {transform_indices = @transform_1, window_bounds = array<i64: 1, 8, 8>}, {pipeline_mode = #tpu.pipeline_mode<synchronous>, transform_indices = @transform_2, window_bounds = array<i64: 16, 128>}, {pipeline_mode = #tpu.pipeline_mode<synchronous>, transform_indices = @transform_3, window_bounds = array<i64: 128, 8>}, {pipeline_mode = #tpu.pipeline_mode<synchronous>, transform_indices = @transform_4, window_bounds = array<i64: 1, 128>}, {transform_indices = @transform_5, window_bounds = array<i64: 1, 8, 128>}, {transform_indices = @transform_6, window_bounds = array<i64: 1, 4, 8, 8>}]} {
    %c0_i32 = arith.constant 0 : i32
    %0 = arith.cmpi eq, %arg1, %c0_i32 : i32
    %1 = arith.extui %0 : i1 to i32
    %c0_i32_0 = arith.constant 0 : i32
    %2 = arith.cmpi ne, %1, %c0_i32_0 : i32
    scf.if %2 {
      %c0_49 = arith.constant 0 : index
      %c0_50 = arith.constant 0 : index
      %c0_51 = arith.constant 0 : index
      %140 = vector.load %arg2[%c0_49, %c0_50, %c0_51] : memref<1x8x16xf32, #tpu.memory_space<vmem>>, vector<1x8x16xf32>
      %141 = vector.shape_cast %140 : vector<1x8x16xf32> to vector<8x16xf32>
      %c0_52 = arith.constant 0 : index
      %c0_53 = arith.constant 0 : index
      %142 = vector.load %arg4[%c0_52, %c0_53] : memref<16x128xf32, #tpu.memory_space<vmem>>, vector<16x128xf32>
      %cst_54 = arith.constant dense<0.000000e+00> : vector<8x128xf32>
      %143 = tpu.matmul %141, %142, %cst_54 {dimension_numbers = #tpu.dot_dimension_numbers<[1], [0], [0], [1], [0, 0, 1, 1], [], []>} : vector<8x16xf32>, vector<16x128xf32>, vector<8x128xf32> -> vector<8x128xf32>
      %c0_55 = arith.constant 0 : index
      %c0_56 = arith.constant 0 : index
      %144 = vector.load %arg9[%c0_55, %c0_56] : memref<8x128xf32, #tpu.memory_space<vmem>>, vector<8x128xf32>
      tpu.vector_store %arg9[%c0_55, %c0_56], %143 {strides = array<i32>} : memref<8x128xf32, #tpu.memory_space<vmem>>, vector<8x128xf32>,
      %145 = math.tanh %143 : vector<8x128xf32>
      %c0_57 = arith.constant 0 : index
      %c0_58 = arith.constant 0 : index
      %146 = vector.load %arg5[%c0_57, %c0_58] : memref<128x8xf32, #tpu.memory_space<vmem>>, vector<128x8xf32>
      %cst_59 = arith.constant dense<0.000000e+00> : vector<8x8xf32>
      %147 = tpu.matmul %145, %146, %cst_59 {dimension_numbers = #tpu.dot_dimension_numbers<[1], [0], [0], [1], [0, 0, 1, 1], [], []>} : vector<8x128xf32>, vector<128x8xf32>, vector<8x8xf32> -> vector<8x8xf32>
      %c0_60 = arith.constant 0 : index
      %c0_61 = arith.constant 0 : index
      %148 = vector.load %arg10[%c0_60, %c0_61] : memref<8x8xf32, #tpu.memory_space<vmem>>, vector<8x8xf32>
      tpu.vector_store %arg10[%c0_60, %c0_61], %147 {strides = array<i32>} : memref<8x8xf32, #tpu.memory_space<vmem>>, vector<8x8xf32>,
    } else {
    }
    %c0 = arith.constant 0 : index
    %c0_1 = arith.constant 0 : index
    %3 = vector.load %arg9[%c0, %c0_1] : memref<8x128xf32, #tpu.memory_space<vmem>>, vector<8x128xf32>
    %c0_2 = arith.constant 0 : index
    %c0_3 = arith.constant 0 : index
    %4 = vector.load %arg10[%c0_2, %c0_3] : memref<8x8xf32, #tpu.memory_space<vmem>>, vector<8x8xf32>
    %c8_i32 = arith.constant 8 : i32
    %5 = arith.muli %arg1, %c8_i32 : i32
    %6 = tpu.assume_multiple %5, 8 : i32
    %7 = arith.index_cast %6 : i32 to index
    %c0_4 = arith.constant 0 : index
    %8 = vector.load %arg10[%7, %c0_4] : memref<8x8xf32, #tpu.memory_space<vmem>>, vector<8x8xf32>
    %c0_5 = arith.constant 0 : index
    %c0_6 = arith.constant 0 : index
    %c0_7 = arith.constant 0 : index
    %9 = vector.load %arg3[%c0_5, %c0_6, %c0_7] : memref<1x8x8xf32, #tpu.memory_space<vmem>>, vector<1x8x8xf32>
    %10 = vector.shape_cast %9 : vector<1x8x8xf32> to vector<8x8xf32>
    %c0_8 = arith.constant 0 : index
    %c0_9 = arith.constant 0 : index
    %11 = vector.load %arg6[%c0_8, %c0_9] : memref<1x128xf32, #tpu.memory_space<vmem>>, vector<1x128xf32>
    %12 = vector.shape_cast %11 : vector<1x128xf32> to vector<128xf32>
    %13 = vector.extract_strided_slice %8 {offsets = [0, 0], sizes = [8, 1], strides = [1, 1]} : vector<8x8xf32> to vector<8x1xf32>
    %14 = vector.extract_strided_slice %4 {offsets = [0, 4], sizes = [8, 1], strides = [1, 1]} : vector<8x8xf32> to vector<8x1xf32>
    %15 = tpu.transpose %14, [1, 0] : vector<8x1xf32> -> vector<1x8xf32>
    %16 = vector.broadcast %13 : vector<8x1xf32> to vector<8x8xf32>
    %17 = vector.broadcast %15 : vector<1x8xf32> to vector<8x8xf32>
    %18 = arith.addf %16, %17 : vector<8x8xf32>
    %cst = arith.constant 2.000000e-01 : f32
    %19 = vector.broadcast %cst : f32 to vector<8x8xf32>
    %20 = arith.mulf %19, %18 : vector<8x8xf32>
    %21 = arith.maximumf %18, %20 : vector<8x8xf32>
    %cst_10 = arith.constant 0.000000e+00 : f32
    %22 = vector.broadcast %cst_10 : f32 to vector<8x8xf32>
    %23 = arith.cmpf ogt, %10, %22 : vector<8x8xf32>
    %cst_11 = arith.constant 0xFF800000 : f32
    %24 = vector.broadcast %cst_11 : f32 to vector<8x8xf32>
    %25 = arith.select %23, %21, %24 : vector<8x8xi1>, vector<8x8xf32>
    %cst_12 = arith.constant dense<0xFF800000> : vector<8xf32>
    %26 = vector.multi_reduction <maximumf>, %25, %cst_12 [1] : vector<8x8xf32> to vector<8xf32>
    %27 = vector.shape_cast %26 : vector<8xf32> to vector<8x1xf32>
    %28 = vector.broadcast %27 : vector<8x1xf32> to vector<8x8xf32>
    %29 = arith.subf %25, %28 : vector<8x8xf32>
    %30 = math.exp %29 : vector<8x8xf32>
    %cst_13 = arith.constant dense<0.000000e+00> : vector<8xf32>
    %31 = vector.multi_reduction <add>, %30, %cst_13 [1] : vector<8x8xf32> to vector<8xf32>
    %32 = vector.shape_cast %31 : vector<8xf32> to vector<8x1xf32>
    %33 = tpu.reciprocal %32 {approx = true} : vector<8x1xf32> -> vector<8x1xf32>
    %34 = vector.broadcast %33 : vector<8x1xf32> to vector<8x8xf32>
    %35 = arith.mulf %30, %34 : vector<8x8xf32>
    %c0_14 = arith.constant 0 : index
    %c0_15 = arith.constant 0 : index
    %c0_16 = arith.constant 0 : index
    %c0_17 = arith.constant 0 : index
    %36 = vector.load %arg8[%c0_14, %c0_15, %c0_16, %c0_17] : memref<1x4x8x8xf32, #tpu.memory_space<vmem>>, vector<1x1x8x8xf32>
    %37 = vector.shape_cast %36 : vector<1x1x8x8xf32> to vector<8x8xf32>
    %38 = vector.shape_cast %35 : vector<8x8xf32> to vector<1x1x8x8xf32>
    tpu.vector_store %arg8[%c0_14, %c0_15, %c0_16, %c0_17], %38 {strides = array<i32>} : memref<1x4x8x8xf32, #tpu.memory_space<vmem>>, vector<1x1x8x8xf32>,
    %39 = vector.extract_strided_slice %3 {offsets = [0, 0], sizes = [8, 32], strides = [1, 1]} : vector<8x128xf32> to vector<8x32xf32>
    %40 = arith.truncf %35 : vector<8x8xf32> to vector<8x8xbf16>
    %41 = arith.truncf %39 : vector<8x32xf32> to vector<8x32xbf16>
    %cst_18 = arith.constant dense<0.000000e+00> : vector<8x32xf32>
    %42 = tpu.matmul %40, %41, %cst_18 {dimension_numbers = #tpu.dot_dimension_numbers<[1], [0], [0], [1], [0, 0, 1, 1], [], []>} : vector<8x8xbf16>, vector<8x32xbf16>, vector<8x32xf32> -> vector<8x32xf32>
    %43 = vector.extract_strided_slice %8 {offsets = [0, 1], sizes = [8, 1], strides = [1, 1]} : vector<8x8xf32> to vector<8x1xf32>
    %44 = vector.extract_strided_slice %4 {offsets = [0, 5], sizes = [8, 1], strides = [1, 1]} : vector<8x8xf32> to vector<8x1xf32>
    %45 = tpu.transpose %44, [1, 0] : vector<8x1xf32> -> vector<1x8xf32>
    %46 = vector.broadcast %43 : vector<8x1xf32> to vector<8x8xf32>
    %47 = vector.broadcast %45 : vector<1x8xf32> to vector<8x8xf32>
    %48 = arith.addf %46, %47 : vector<8x8xf32>
    %cst_19 = arith.constant 2.000000e-01 : f32
    %49 = vector.broadcast %cst_19 : f32 to vector<8x8xf32>
    %50 = arith.mulf %49, %48 : vector<8x8xf32>
    %51 = arith.maximumf %48, %50 : vector<8x8xf32>
    %cst_20 = arith.constant 0.000000e+00 : f32
    %52 = vector.broadcast %cst_20 : f32 to vector<8x8xf32>
    %53 = arith.cmpf ogt, %10, %52 : vector<8x8xf32>
    %cst_21 = arith.constant 0xFF800000 : f32
    %54 = vector.broadcast %cst_21 : f32 to vector<8x8xf32>
    %55 = arith.select %53, %51, %54 : vector<8x8xi1>, vector<8x8xf32>
    %cst_22 = arith.constant dense<0xFF800000> : vector<8xf32>
    %56 = vector.multi_reduction <maximumf>, %55, %cst_22 [1] : vector<8x8xf32> to vector<8xf32>
    %57 = vector.shape_cast %56 : vector<8xf32> to vector<8x1xf32>
    %58 = vector.broadcast %57 : vector<8x1xf32> to vector<8x8xf32>
    %59 = arith.subf %55, %58 : vector<8x8xf32>
    %60 = math.exp %59 : vector<8x8xf32>
    %cst_23 = arith.constant dense<0.000000e+00> : vector<8xf32>
    %61 = vector.multi_reduction <add>, %60, %cst_23 [1] : vector<8x8xf32> to vector<8xf32>
    %62 = vector.shape_cast %61 : vector<8xf32> to vector<8x1xf32>
    %63 = tpu.reciprocal %62 {approx = true} : vector<8x1xf32> -> vector<8x1xf32>
    %64 = vector.broadcast %63 : vector<8x1xf32> to vector<8x8xf32>
    %65 = arith.mulf %60, %64 : vector<8x8xf32>
    %c0_24 = arith.constant 0 : index
    %c1 = arith.constant 1 : index
    %c0_25 = arith.constant 0 : index
    %c0_26 = arith.constant 0 : index
    %66 = vector.load %arg8[%c0_24, %c1, %c0_25, %c0_26] : memref<1x4x8x8xf32, #tpu.memory_space<vmem>>, vector<1x1x8x8xf32>
    %67 = vector.shape_cast %66 : vector<1x1x8x8xf32> to vector<8x8xf32>
    %68 = vector.shape_cast %65 : vector<8x8xf32> to vector<1x1x8x8xf32>
    tpu.vector_store %arg8[%c0_24, %c1, %c0_25, %c0_26], %68 {strides = array<i32>} : memref<1x4x8x8xf32, #tpu.memory_space<vmem>>, vector<1x1x8x8xf32>,
    %69 = vector.extract_strided_slice %3 {offsets = [0, 32], sizes = [8, 32], strides = [1, 1]} : vector<8x128xf32> to vector<8x32xf32>
    %70 = arith.truncf %65 : vector<8x8xf32> to vector<8x8xbf16>
    %71 = arith.truncf %69 : vector<8x32xf32> to vector<8x32xbf16>
    %cst_27 = arith.constant dense<0.000000e+00> : vector<8x32xf32>
    %72 = tpu.matmul %70, %71, %cst_27 {dimension_numbers = #tpu.dot_dimension_numbers<[1], [0], [0], [1], [0, 0, 1, 1], [], []>} : vector<8x8xbf16>, vector<8x32xbf16>, vector<8x32xf32> -> vector<8x32xf32>
    %73 = vector.extract_strided_slice %8 {offsets = [0, 2], sizes = [8, 1], strides = [1, 1]} : vector<8x8xf32> to vector<8x1xf32>
    %74 = vector.extract_strided_slice %4 {offsets = [0, 6], sizes = [8, 1], strides = [1, 1]} : vector<8x8xf32> to vector<8x1xf32>
    %75 = tpu.transpose %74, [1, 0] : vector<8x1xf32> -> vector<1x8xf32>
    %76 = vector.broadcast %73 : vector<8x1xf32> to vector<8x8xf32>
    %77 = vector.broadcast %75 : vector<1x8xf32> to vector<8x8xf32>
    %78 = arith.addf %76, %77 : vector<8x8xf32>
    %cst_28 = arith.constant 2.000000e-01 : f32
    %79 = vector.broadcast %cst_28 : f32 to vector<8x8xf32>
    %80 = arith.mulf %79, %78 : vector<8x8xf32>
    %81 = arith.maximumf %78, %80 : vector<8x8xf32>
    %cst_29 = arith.constant 0.000000e+00 : f32
    %82 = vector.broadcast %cst_29 : f32 to vector<8x8xf32>
    %83 = arith.cmpf ogt, %10, %82 : vector<8x8xf32>
    %cst_30 = arith.constant 0xFF800000 : f32
    %84 = vector.broadcast %cst_30 : f32 to vector<8x8xf32>
    %85 = arith.select %83, %81, %84 : vector<8x8xi1>, vector<8x8xf32>
    %cst_31 = arith.constant dense<0xFF800000> : vector<8xf32>
    %86 = vector.multi_reduction <maximumf>, %85, %cst_31 [1] : vector<8x8xf32> to vector<8xf32>
    %87 = vector.shape_cast %86 : vector<8xf32> to vector<8x1xf32>
    %88 = vector.broadcast %87 : vector<8x1xf32> to vector<8x8xf32>
    %89 = arith.subf %85, %88 : vector<8x8xf32>
    %90 = math.exp %89 : vector<8x8xf32>
    %cst_32 = arith.constant dense<0.000000e+00> : vector<8xf32>
    %91 = vector.multi_reduction <add>, %90, %cst_32 [1] : vector<8x8xf32> to vector<8xf32>
    %92 = vector.shape_cast %91 : vector<8xf32> to vector<8x1xf32>
    %93 = tpu.reciprocal %92 {approx = true} : vector<8x1xf32> -> vector<8x1xf32>
    %94 = vector.broadcast %93 : vector<8x1xf32> to vector<8x8xf32>
    %95 = arith.mulf %90, %94 : vector<8x8xf32>
    %c0_33 = arith.constant 0 : index
    %c2 = arith.constant 2 : index
    %c0_34 = arith.constant 0 : index
    %c0_35 = arith.constant 0 : index
    %96 = vector.load %arg8[%c0_33, %c2, %c0_34, %c0_35] : memref<1x4x8x8xf32, #tpu.memory_space<vmem>>, vector<1x1x8x8xf32>
    %97 = vector.shape_cast %96 : vector<1x1x8x8xf32> to vector<8x8xf32>
    %98 = vector.shape_cast %95 : vector<8x8xf32> to vector<1x1x8x8xf32>
    tpu.vector_store %arg8[%c0_33, %c2, %c0_34, %c0_35], %98 {strides = array<i32>} : memref<1x4x8x8xf32, #tpu.memory_space<vmem>>, vector<1x1x8x8xf32>,
    %99 = vector.extract_strided_slice %3 {offsets = [0, 64], sizes = [8, 32], strides = [1, 1]} : vector<8x128xf32> to vector<8x32xf32>
    %100 = arith.truncf %95 : vector<8x8xf32> to vector<8x8xbf16>
    %101 = arith.truncf %99 : vector<8x32xf32> to vector<8x32xbf16>
    %cst_36 = arith.constant dense<0.000000e+00> : vector<8x32xf32>
    %102 = tpu.matmul %100, %101, %cst_36 {dimension_numbers = #tpu.dot_dimension_numbers<[1], [0], [0], [1], [0, 0, 1, 1], [], []>} : vector<8x8xbf16>, vector<8x32xbf16>, vector<8x32xf32> -> vector<8x32xf32>
    %103 = vector.extract_strided_slice %8 {offsets = [0, 3], sizes = [8, 1], strides = [1, 1]} : vector<8x8xf32> to vector<8x1xf32>
    %104 = vector.extract_strided_slice %4 {offsets = [0, 7], sizes = [8, 1], strides = [1, 1]} : vector<8x8xf32> to vector<8x1xf32>
    %105 = tpu.transpose %104, [1, 0] : vector<8x1xf32> -> vector<1x8xf32>
    %106 = vector.broadcast %103 : vector<8x1xf32> to vector<8x8xf32>
    %107 = vector.broadcast %105 : vector<1x8xf32> to vector<8x8xf32>
    %108 = arith.addf %106, %107 : vector<8x8xf32>
    %cst_37 = arith.constant 2.000000e-01 : f32
    %109 = vector.broadcast %cst_37 : f32 to vector<8x8xf32>
    %110 = arith.mulf %109, %108 : vector<8x8xf32>
    %111 = arith.maximumf %108, %110 : vector<8x8xf32>
    %cst_38 = arith.constant 0.000000e+00 : f32
    %112 = vector.broadcast %cst_38 : f32 to vector<8x8xf32>
    %113 = arith.cmpf ogt, %10, %112 : vector<8x8xf32>
    %cst_39 = arith.constant 0xFF800000 : f32
    %114 = vector.broadcast %cst_39 : f32 to vector<8x8xf32>
    %115 = arith.select %113, %111, %114 : vector<8x8xi1>, vector<8x8xf32>
    %cst_40 = arith.constant dense<0xFF800000> : vector<8xf32>
    %116 = vector.multi_reduction <maximumf>, %115, %cst_40 [1] : vector<8x8xf32> to vector<8xf32>
    %117 = vector.shape_cast %116 : vector<8xf32> to vector<8x1xf32>
    %118 = vector.broadcast %117 : vector<8x1xf32> to vector<8x8xf32>
    %119 = arith.subf %115, %118 : vector<8x8xf32>
    %120 = math.exp %119 : vector<8x8xf32>
    %cst_41 = arith.constant dense<0.000000e+00> : vector<8xf32>
    %121 = vector.multi_reduction <add>, %120, %cst_41 [1] : vector<8x8xf32> to vector<8xf32>
    %122 = vector.shape_cast %121 : vector<8xf32> to vector<8x1xf32>
    %123 = tpu.reciprocal %122 {approx = true} : vector<8x1xf32> -> vector<8x1xf32>
    %124 = vector.broadcast %123 : vector<8x1xf32> to vector<8x8xf32>
    %125 = arith.mulf %120, %124 : vector<8x8xf32>
    %c0_42 = arith.constant 0 : index
    %c3 = arith.constant 3 : index
    %c0_43 = arith.constant 0 : index
    %c0_44 = arith.constant 0 : index
    %126 = vector.load %arg8[%c0_42, %c3, %c0_43, %c0_44] : memref<1x4x8x8xf32, #tpu.memory_space<vmem>>, vector<1x1x8x8xf32>
    %127 = vector.shape_cast %126 : vector<1x1x8x8xf32> to vector<8x8xf32>
    %128 = vector.shape_cast %125 : vector<8x8xf32> to vector<1x1x8x8xf32>
    tpu.vector_store %arg8[%c0_42, %c3, %c0_43, %c0_44], %128 {strides = array<i32>} : memref<1x4x8x8xf32, #tpu.memory_space<vmem>>, vector<1x1x8x8xf32>,
    %129 = vector.extract_strided_slice %3 {offsets = [0, 96], sizes = [8, 32], strides = [1, 1]} : vector<8x128xf32> to vector<8x32xf32>
    %130 = arith.truncf %125 : vector<8x8xf32> to vector<8x8xbf16>
    %131 = arith.truncf %129 : vector<8x32xf32> to vector<8x32xbf16>
    %cst_45 = arith.constant dense<0.000000e+00> : vector<8x32xf32>
    %132 = tpu.matmul %130, %131, %cst_45 {dimension_numbers = #tpu.dot_dimension_numbers<[1], [0], [0], [1], [0, 0, 1, 1], [], []>} : vector<8x8xbf16>, vector<8x32xbf16>, vector<8x32xf32> -> vector<8x32xf32>
    %133 = tpu.concatenate %42, %72, %102, %132 in 1 : vector<8x32xf32>, vector<8x32xf32>, vector<8x32xf32>, vector<8x32xf32> -> vector<8x128xf32>
    %134 = vector.shape_cast %12 : vector<128xf32> to vector<1x128xf32>
    %135 = vector.broadcast %134 : vector<1x128xf32> to vector<8x128xf32>
    %136 = arith.addf %133, %135 : vector<8x128xf32>
    %c0_46 = arith.constant 0 : index
    %c0_47 = arith.constant 0 : index
    %c0_48 = arith.constant 0 : index
    %137 = vector.load %arg7[%c0_46, %c0_47, %c0_48] : memref<1x8x128xf32, #tpu.memory_space<vmem>>, vector<1x8x128xf32>
    %138 = vector.shape_cast %137 : vector<1x8x128xf32> to vector<8x128xf32>
    %139 = vector.shape_cast %136 : vector<8x128xf32> to vector<1x8x128xf32>
    tpu.vector_store %arg7[%c0_46, %c0_47, %c0_48], %139 {strides = array<i32>} : memref<1x8x128xf32, #tpu.memory_space<vmem>>, vector<1x8x128xf32>,
    return
  }
  func.func @transform_0(%arg0: i32, %arg1: i32) -> (i32, i32, i32) {
    %c0_i32 = arith.constant 0 : i32
    %c0_i32_0 = arith.constant 0 : i32
    %c0_i32_1 = arith.constant 0 : i32
    return %arg0, %c0_i32, %c0_i32_0 : i32, i32, i32
  }
  func.func @transform_1(%arg0: i32, %arg1: i32) -> (i32, i32, i32) {
    %c0_i32 = arith.constant 0 : i32
    %c0_i32_0 = arith.constant 0 : i32
    return %arg0, %arg1, %c0_i32 : i32, i32, i32
  }
  func.func @transform_2(%arg0: i32, %arg1: i32) -> (i32, i32) {
    %c0_i32 = arith.constant 0 : i32
    %c0_i32_0 = arith.constant 0 : i32
    %c0_i32_1 = arith.constant 0 : i32
    return %c0_i32, %c0_i32_0 : i32, i32
  }
  func.func @transform_3(%arg0: i32, %arg1: i32) -> (i32, i32) {
    %c0_i32 = arith.constant 0 : i32
    %c0_i32_0 = arith.constant 0 : i32
    %c0_i32_1 = arith.constant 0 : i32
    return %c0_i32, %c0_i32_0 : i32, i32
  }
  func.func @transform_4(%arg0: i32, %arg1: i32) -> (i32, i32) {
    %c0_i32 = arith.constant 0 : i32
    %c0_i32_0 = arith.constant 0 : i32
    %c0_i32_1 = arith.constant 0 : i32
    return %c0_i32, %c0_i32_0 : i32, i32
  }
  func.func @transform_5(%arg0: i32, %arg1: i32) -> (i32, i32, i32) {
    %c0_i32 = arith.constant 0 : i32
    %c0_i32_0 = arith.constant 0 : i32
    return %arg0, %arg1, %c0_i32 : i32, i32, i32
  }
  func.func @transform_6(%arg0: i32, %arg1: i32) -> (i32, i32, i32, i32) {
    %c0_i32 = arith.constant 0 : i32
    %c0_i32_0 = arith.constant 0 : i32
    %c0_i32_1 = arith.constant 0 : i32
    return %arg0, %c0_i32, %arg1, %c0_i32_0 : i32, i32, i32, i32
  }
}

</mosaic_0001>

<bundles_post_ra>
// kernel: tpu_custom_call.1
= control target key start
LH: loop header
LB: loop body
LE: loop exit
PB: predicated region body
PF: predicated region fallthrough
CT: control target
= control target key end

     0   :  { %12 = vsyncpa [#allocation5], 0  ;;  %s1760_s0 = inlined_call_operand.vmem [shape: f32[2,8,16], index: 0, kind: input, shape index: {}]   ;;  %s1761_s1 = inlined_call_operand.vmem [shape: f32[2,8,8], index: 1, kind: input, shape index: {}]   ;;  %s1762_s2 = inlined_call_operand.vmem [shape: f32[16,128], index: 2, kind: input, shape index: {}]   ;;  %s1763_s3 = inlined_call_operand.vmem [shape: f32[128,8], index: 3, kind: input, shape index: {}]   ;;  %s1764_s4 = inlined_call_operand.vmem [shape: f32[1,128], index: 4, kind: input, shape index: {}]   ;;  %s1765_s5 = inlined_call_operand.hbm [shape: f32[2,8,128], index: 5, kind: output, shape index: {0}]   ;;  %s1766_s6 = inlined_call_operand.hbm [shape: f32[2,4,8,8], index: 6, kind: output, shape index: {1}]  }
   0x1   :  { %14 = vsyncpa [#allocation5 + $0x1], 0 }
   0x2   :  { %15 = vsyncpa [#allocation7], 0 }
   0x3   :  { %17 = vsyncpa [#allocation7 + $0x1], 0  ;;  %s1480_s21 = smov 0   ;;  %s1482_s22 = smov 0  }
   0x4   :  { %s1484_s23 = smov 0   ;;  %s1486_s24 = smov 0  }
   0x5   :  { %s1488_s25 = smov 0   ;;  %s1490_s26 = smov 0  }
   0x6 LB: > { %s1103_s27 = sadd.s32 4294967295, %s1426_s26   ;;  %s1104_s28 = sadd.s32 4294967294, %s1426_s26   ;;  %s1426_s26 = sphi %s1490_s26, %s23_s26   ;;  %s1422_s25 = sphi %s1488_s25, %s1773_s25   ;;  %s1418_s24 = sphi %s1486_s24, %s1772_s24   ;;  %s1414_s23 = sphi %s1484_s23, %s1771_s23   ;;  %s1410_s22 = sphi %s1482_s22, %s1770_s22   ;;  %s1406_s21 = sphi %s1480_s21, %s1769_s21  }
   0x7   : > { %s35_s29 = sadd.s32 1, %s1422_s25  ;;  %s161_s30 = sadd.s32 1, %s1414_s23 }
   0x8   : > { %p37_p0 = scmp.ge.s32.totalorder %s35_s29, 2  ;;  %p171_p1 = scmp.ne.s32.totalorder %s1414_s23, %s1410_s22 }
   0x9   : > { %p172_p2 = scmp.eq.s32.totalorder %s1103_s27, 1  ;;  %p177_p3 = scmp.ne.s32.totalorder %s1410_s22, %s1406_s21 }
   0xa   : > { %s1775_s29 = smov (%p37_p0, %s35_s29), 0  ;;  %p178_p5 = scmp.eq.s32.totalorder %s1104_s28, 1 }
   0xb   : > { %p1520_p4 = por %p172_p2, %p171_p1  ;;  %s156_s8 = ssub.s32 %s1422_s25, %s1775_s29 }
   0xc   : > { %p1107_p6 = scmp.ge.s32.totalorder %s1426_s26, 1  ;;  %p159_p7 = scmp.eq.s32.totalorder %s156_s8, 0 }
   0xd   : > { %p1527_p8 = por %p178_p5, %p177_p3  ;;  %p250_p9 = scmp.lt.s32.totalorder %s1426_s26, 3 }
   0xe   : > { %s1533_s10 = scalar_select %p159_p7, %s1414_s23, %s161_s30  }
   0xf   : > { %p251_p10 = pnand %p1107_p6, %p250_p9 }
  0x10   : > { %p291_p11 = scmp.lt.s32.totalorder (!%p251_p10), %s1418_s24, 1  ;;  %s1432_s14 = smov (!%p251_p10), 122  }
  0x11   : > { %254 = sbr.rel (%p251_p10) target bundleno = 1399 (0x577), region = 40  ;;  %s1433_s15 = smov (!%p251_p10), 124  }
  0x12   : > { %s1434_s16 = smov (!%p251_p10), 121   ;;  %s1435_s18 = smov (!%p251_p10), 123  }
  0x13   : > { %s1440_s30 = smov (!%p251_p10), 32   ;;  %s1654_s8 = sand.u32 (!%p251_p10), 1, %s1410_s22  }
  0x14   : > { %s953_s19 = scalar_lea.sflag (!%p251_p10), [#allocation7], %s1654_s8 }
  0x16   : > { %v309_v0 = vld [vmem:[%s1762_s2 + $0x8] sm:$0xff]  ;;  %v1428_v1 = vmov 0.0   ;;  %v308_v2 = vld [vmem:[%s1762_s2] sm:$0xff]  ;;  %vm1429_vm0 = vmmov 0   ;;  %v401_v3 = vld [vmem:[%s1763_s3 + $0x78] sm:$0xff]  ;;  %s1549_s17 = scalar_select %p291_p11, %s1418_s24, 1  ;;  %v522_v36 = vlaneseq }
  0x17   : > { %1157 = vmatprep.subr.mxu0 %v1428_v1  ;;  %1161 = vmatprep.mubr.msk.f32.mxu0 %vm1429_vm0, %v1428_v1  ;;  %v400_v4 = vld [vmem:[%s1763_s3 + $0x70] sm:$0xff]  ;;  %vm310_vm1 = vcmask 130048   ;;  %v399_v5 = vld [vmem:[%s1763_s3 + $0x68] sm:$0xff]  ;;  %v398_v7 = vld [vmem:[%s1763_s3 + $0x60] sm:$0xff]  ;;  %vm549_vm2 = vcmask 1043456   ;;  %v1430_v25 = vmov 1  }
  0x18   : > { %1158 = vmatpush3.msra.mxu0 %v309_v0  ;;  %1164 = vmatprep.subr.mxu1 %v1428_v1  ;;  %s1110_s20 = sshll.u32 %s1549_s17, 3  ;;  %v397_v8 = vld [vmem:[%s1763_s3 + $0x58] sm:$0xff]  ;;  %v396_v9 = vld [vmem:[%s1763_s3 + $0x50] sm:$0xff]  ;;  %v395_v10 = vld [vmem:[%s1763_s3 + $0x48] sm:$0xff]  ;;  %v1431_v26 = vmov 0   ;;  %vm472_vm3 = vcmask 64512  }
  0x19   : > { %1159 = vmatprep.subr.mxu0 %v1428_v1  ;;  %1165 = vmatpush3.msra.mxu1 %v401_v3  ;;  %s294_s11 = scalar_lea.vmem %s1760_s0, %s1110_s20  ;;  %v394_v11 = vld [vmem:[%s1763_s3 + $0x40] sm:$0xff]  ;;  %v393_v12 = vld [vmem:[%s1763_s3 + $0x38] sm:$0xff]  ;;  %v392_v13 = vld [vmem:[%s1763_s3 + $0x30] sm:$0xff]  ;;  %v1436_v30 = vmov 2   ;;  %v1437_v31 = vmov 3   ;;  %v523_v38 = vshrl.u32 %v522_v36, 7  ;;  %s301_s28 = scalar_lea.vmem %s1761_s1, %s1110_s20 }
  0x1a   : > { %1160 = vmatpush3.msra.mxu0 %v308_v2  ;;  %1166 = vmatprep.subr.mxu1 %v1428_v1  ;;  %v307_v6 = vld [vmem:[%s294_s11] sm:$0xff]  ;;  %v391_v14 = vld [vmem:[%s1763_s3 + $0x28] sm:$0xff]  ;;  %v389_v16 = vld [vmem:[%s1763_s3 + $0x18] sm:$0xff]  ;;  %s1438_s17 = smov 96   ;;  %s1439_s20 = smov 64  }
  0x1b   : > { %1167 = vmatpush3.msra.mxu1 %v400_v4  ;;  %1199 = vmatprep.subr.bf16.mxu0 %v1428_v1  ;;  %v390_v15 = vld [vmem:[%s1763_s3 + $0x20] sm:$0xff]  ;;  %v388_v17 = vld [vmem:[%s1763_s3 + $0x10] sm:$0xff]  ;;  %v387_v18 = vld [vmem:[%s1763_s3 + $0x8] sm:$0xff]  ;;  %v524_v41 = vsub.s32 0, %v523_v38  ;;  %s1109_s11 = sshll.u32 %s1654_s8, 5 }
  0x1c   : > { %1168 = vmatprep.subr.mxu1 %v1428_v1  ;;  %1196 = vmatprep.mubr.msk.f32.mxu1 %vm1429_vm0, %v1428_v1  ;;  %v386_v19 = vld [vmem:[%s1763_s3] sm:$0xff]  ;;  %s1657_s12 = scalar_lea.vmem [#allocation6], %s1109_s11 }
  0x1d   : > { %1162 = vmatmul.mubr.msk.f32.vlgmr.msra.gmra.mxu0 %vm310_vm1, %v307_v6  ;;  %1169 = vmatpush3.msra.mxu1 %v399_v5  ;;  %v479_v46 = vld [vmem:[%s301_s28] sm:$0xff]  ;;  %s981_s13 = sshll.u32 %s1657_s12, 4  ;;  %s1441_s28 = smov [#allocation6]   ;;  %s1686_s13 = int_to_ptr.vmem [resolvable:$true] %s981_s13 }
  0x1e   : > { %1170 = vmatprep.subr.mxu1 %v1428_v1  ;;  %1201 = vmatprep.mubr.msk.bf16.mxu0 %vm1429_vm0, %v1428_v1  ;;  %vm529_vm4 = vcmp.gt.f32.partialorder %v479_v46, 0.0  ;;  %s1320_s27 = scalar_lea.vmem %s1686_s13, 512 }
  0x1f   : > { %1171 = vmatpush3.msra.mxu1 %v398_v7  ;;  %1299 = vset.pattern.permute.xlu1 %v1430_v25  ;;  %p1321_p12 = scmp.ne.s32.totalorder %s1686_s13, %s1320_s27 }
  0x20   : > { %1172 = vmatprep.subr.mxu1 %v1428_v1  ;;  %1298 = vset.pattern.permute.xlu0 %v1431_v26 }
  0x21   : > { %1173 = vmatpush3.msra.mxu1 %v397_v8  ;;  %p1322_p13 = pnand %p1321_p12, %p1520_p4 }
  0x22   : > { %1174 = vmatprep.subr.mxu1 %v1428_v1 }
  0x23   : > { %1175 = vmatpush3.msra.mxu1 %v396_v9  ;;  %p1323_p0 = pneg %p1322_p13 }
  0x24   : > { %1176 = vmatprep.subr.mxu1 %v1428_v1 }
  0x25   : > { %1177 = vmatpush3.msra.mxu1 %v395_v10 }
  0x26   : > { %1178 = vmatprep.subr.mxu1 %v1428_v1 }
  0x27   : > { %1179 = vmatpush3.msra.mxu1 %v394_v11 }
  0x28   : > { %1180 = vmatprep.subr.mxu1 %v1428_v1 }
  0x29   : > { %1181 = vmatpush3.msra.mxu1 %v393_v12 }
  0x2a   : > { %1182 = vmatprep.subr.mxu1 %v1428_v1 }
  0x2b   : > { %1183 = vmatpush3.msra.mxu1 %v392_v13 }
  0x2c   : > { %1184 = vmatprep.subr.mxu1 %v1428_v1 }
  0x2d   : > { %1185 = vmatpush3.msra.mxu1 %v391_v14 }
  0x2e   : > { %1186 = vmatprep.subr.mxu1 %v1428_v1 }
  0x2f   : > { %1187 = vmatpush3.msra.mxu1 %v390_v15 }
  0x30   : > { %1188 = vmatprep.subr.mxu1 %v1428_v1 }
  0x31   : > { %1189 = vmatpush3.msra.mxu1 %v389_v16 }
  0x32   : > { %1190 = vmatprep.subr.mxu1 %v1428_v1 }
  0x33   : > { %1191 = vmatpush3.msra.mxu1 %v388_v17 }
  0x34   : > { %1192 = vmatprep.subr.mxu1 %v1428_v1 }
  0x35   : > { %1193 = vmatpush3.msra.mxu1 %v387_v18 }
  0x36   : > { %1194 = vmatprep.subr.mxu1 %v1428_v1 }
  0x37   : > { %1195 = vmatpush3.msra.mxu1 %v386_v19 }
  0xdd   : > { %v380_v20 = vpop.f32.mrf.mxu0 }
  0xde   : > { %1302 = vtanh.f32 %v380_v20  ;;  %v1624_v21 = vpack.c.bf16 %v380_v20, %v380_v20 }
  0xdf   : > { %v1163_v22 = vpop.f32.mrf.mxu0 }
  0xe0   : > { %v551_v23 = vsel %vm549_vm2, %v1624_v21, 0 }
  0xe1   : > { %1200 = vmatpush3.bf16.msra.mxu0 %v551_v23 }
  0xe2   : > { %1205 = vmatprep.subr.bf16.mxu0 %v1428_v1 }
  0xeb   : > { %v1303_v24 = vpop.eup %1302 }
  0xec   : > { %1197 = vmatmul.mubr.f32.vlgmr.msra.gmra.mxu1 %v1303_v24 }
 0x1ac   : > { %v468_v27 = vpop.f32.mrf.mxu1 }
 0x1ad   : > { %473 = vst.msk [vmem:[#allocation3] sm:$0xff] %vm472_vm3, %v468_v27 }
 0x1ae   : > { %v1198_v28 = vpop.f32.mrf.mxu1 }
 0x1b4   : > { %v475_v29 = vld [vmem:[#allocation3] sm:$0xff] }
 0x1b5   : > { %703 = vrot.lane.b32.xlu1 %v475_v29, %s1432_s14  ;;  %482 = vrot.lane.b32.xlu0 %v475_v29, %s1433_s15  ;;  %s1128_s14 = sshll.u32 %s1418_s24, 9 }
 0x1b9   : > { %812 = vrot.lane.b32.xlu1 %v475_v29, %s1434_s16  ;;  %593 = vrot.lane.b32.xlu0 %v475_v29, %s1435_s18  ;;  %s1691_s18 = scalar_lea.hbm %s1766_s6, %s1128_s14 }
 0x1bd   : > { %629 = vperm.xlu1 %1299, %v475_v29   ;;  %519 = vperm.xlu0 %1298, %v475_v29  }
 0x1c1   : > { %1300 = vset.pattern.permute.xlu1 %v1436_v30  ;;  %1301 = vset.pattern.permute.xlu0 %v1437_v31 }
 0x1c2   : > { %739 = vperm.xlu1 %1300, %v475_v29   ;;  %848 = vperm.xlu0 %1301, %v475_v29  }
 0x227   : > { %v704_v32 = vpop.permute.xlu1 %703  ;;  %v483_v33 = vpop.permute.xlu0 %482 }
 0x228   : > { %485 = vxpose.xlu1.b32.start.end [1/1] (short) (narrow) %v483_v33, 8 }
 0x22b   : > { %v813_v34 = vpop.permute.xlu1 %812  ;;  %v594_v35 = vpop.permute.xlu0 %593 }
 0x22c   : > { %815 = vxpose.xlu1.b32.start.end [1/1] (short) (narrow) %v813_v34, 8  ;;  %596 = vxpose.xlu0.b32.start.end [1/1] (short) (narrow) %v594_v35, 8 }
 0x230   : > { %706 = vxpose.xlu0.b32.start.end [1/1] (short) (narrow) %v704_v32, 8 }
 0x238   : > { %v630_v37 = vpop.permute.xlu1 %629  ;;  %v520_v39 = vpop.permute.xlu0 %519 }
 0x23d   : > { %v740_v40 = vpop.permute.xlu1 %739  ;;  %v849_v42 = vpop.permute.xlu0 %848 }
 0x2a4   : > { %v501_v43 = vpop.trf.xlu1 }
 0x2a5   : > { %v525_v44 = vrot.slane %v501_v43, %v524_v41 }
 0x2a7   : > { %v526_v45 = vadd.f32 %v525_v44, %v520_v39 }
 0x2a8   : > { %v831_v47 = vpop.trf.xlu1  ;;  %v612_v48 = vpop.trf.xlu0 }
 0x2a9   : > { %v527_v49 = vmul.f32 0.2, %v526_v45  ;;  %v854_v50 = vrot.slane %v831_v47, %v524_v41  ;;  %v635_v51 = vrot.slane %v612_v48, %v524_v41 }
 0x2ab   : > { %v855_v52 = vadd.f32 %v854_v50, %v849_v42  ;;  %v636_v53 = vadd.f32 %v635_v51, %v630_v37  ;;  %v528_v54 = vmax.f32 %v526_v45, %v527_v49 }
 0x2ac   : > { %v722_v55 = vpop.trf.xlu0 }
 0x2ad   : > { %v856_v56 = vmul.f32 0.2, %v855_v52  ;;  %v637_v57 = vmul.f32 0.2, %v636_v53  ;;  %v745_v58 = vrot.slane %v722_v55, %v524_v41  ;;  %v530_v59 = vsel %vm529_vm4, %v528_v54, -inf }
 0x2ae   : > { %v532_v60 = vsel %vm472_vm3, %v530_v59, -inf }
 0x2af   : > { %v746_v61 = vadd.f32 %v745_v58, %v740_v40  ;;  %533 = vmax.xlane.f32.xlu0 %v532_v60  ;;  %v857_v62 = vmax.f32 %v855_v52, %v856_v56  ;;  %v638_v63 = vmax.f32 %v636_v53, %v637_v57 }
 0x2b1   : > { %v747_v0 = vmul.f32 0.2, %v746_v61  ;;  %v858_v2 = vsel %vm529_vm4, %v857_v62, -inf  ;;  %v639_v3 = vsel %vm529_vm4, %v638_v63, -inf }
 0x2b2   : > { %v859_v4 = vsel %vm472_vm3, %v858_v2, -inf  ;;  %v640_v5 = vsel %vm472_vm3, %v639_v3, -inf }
 0x2b3   : > { %860 = vmax.xlane.f32.xlu0 %v859_v4  ;;  %641 = vmax.xlane.f32.xlu1 %v640_v5  ;;  %v748_v6 = vmax.f32 %v746_v61, %v747_v0 }
 0x2b5   : > { %v749_v7 = vsel %vm529_vm4, %v748_v6, -inf }
 0x2b6   : > { %v750_v8 = vsel %vm472_vm3, %v749_v7, -inf }
 0x2b7   : > { %751 = vmax.xlane.f32.xlu1 %v750_v8 }
 0x338   : > { %v534_v9 = vpop.xlane.xlu0 %533 }
 0x339   : > { %v535_v10 = vsub.f32 %v530_v59, %v534_v9 }
 0x33b   : > { %v536_v11 = vmul.f32 1.442695, %v535_v10 }
 0x33c   : > { %v642_v12 = vpop.xlane.xlu1 %641  ;;  %v861_v13 = vpop.xlane.xlu0 %860 }
 0x33d   : > { %1304 = vpow2.f32 %v536_v11  ;;  %v643_v14 = vsub.f32 %v639_v3, %v642_v12  ;;  %v862_v15 = vsub.f32 %v858_v2, %v861_v13 }
 0x33f   : > { %v644_v16 = vmul.f32 1.442695, %v643_v14  ;;  %v863_v17 = vmul.f32 1.442695, %v862_v15 }
 0x340   : > { %v752_v25 = vpop.xlane.xlu1 %751 }
 0x341   : > { %1306 = vpow2.f32 %v644_v16  ;;  %v753_v26 = vsub.f32 %v749_v7, %v752_v25 }
 0x342   : > { %1308 = vpow2.f32 %v863_v17 }
 0x343   : > { %v754_v27 = vmul.f32 1.442695, %v753_v26 }
 0x345   : > { %1310 = vpow2.f32 %v754_v27 }
 0x34a   : > { %v1305_v18 = vpop.eup %1304 }
 0x34b   : > { %v538_v19 = vsel %vm472_vm3, %v1305_v18, 0.0 }
 0x34c   : > { %539 = vadd.xlane.f32.xlu1 %v538_v19 }
 0x34e   : > { %v1307_v20 = vpop.eup %1306 }
 0x34f   : > { %v646_v22 = vsel %vm472_vm3, %v1307_v20, 0.0  ;;  %v1309_v23 = vpop.eup %1308 }
 0x350   : > { %647 = vadd.xlane.f32.xlu0 %v646_v22  ;;  %v865_v24 = vsel %vm472_vm3, %v1309_v23, 0.0 }
 0x352   : > { %v1311_v28 = vpop.eup %1310 }
 0x353   : > { %v756_v29 = vsel %vm472_vm3, %v1311_v28, 0.0 }
 0x354   : > { %866 = vadd.xlane.f32.xlu0 %v865_v24 }
 0x35d   : > { %655 = vrot.lane.b32.xlu1 %v1624_v21, %s1438_s17 }
 0x36a   : > { %764 = vrot.lane.b32.xlu0 %v1624_v21, %s1439_s20 }
 0x381   : > { %757 = vadd.xlane.f32.xlu1 %v756_v29 }
 0x392   : > { %873 = vrot.lane.b32.xlu1 %v1624_v21, %s1440_s30 }
 0x3d5   : > { %v540_v30 = vpop.xlane.xlu1 %539 }
 0x3d6   : > { %1312 = vrcp.f32 %v540_v30 }
 0x3d9   : > { %v648_v31 = vpop.xlane.xlu0 %647  ;;  %v656_v35 = vpop.permute.xlu1 %655 }
 0x3da   : > { %1314 = vrcp.f32 %v648_v31  ;;  %v661_v37 = vsel %vm549_vm2, %v656_v35, 0 }
 0x3dd   : > { %v867_v32 = vpop.xlane.xlu0 %866 }
 0x3de   : > { %1316 = vrcp.f32 %v867_v32 }
 0x3e1   : > { %v765_v41 = vpop.permute.xlu0 %764 }
 0x3e2   : > { %v770_v43 = vsel %vm549_vm2, %v765_v41, 0 }
 0x3e3   : > { %v1313_v33 = vpop.eup %1312 }
 0x3e4   : > { %v542_v34 = vmul.f32 %v1313_v33, %v1305_v18 }
 0x3e6   : > { %v544_v36 = vpack.c.bf16 %v542_v34, %v542_v34  ;;  %543 = vst.msk [vmem:[%s1657_s12] sm:$0xff] %vm472_vm3, %v542_v34 }
 0x3e7   : > { %v1315_v21 = vpop.eup %1314 }
 0x3e8   : > { %1202 = vmatmul.mubr.msk.bf16.vlgmr.msra.gmra.mxu0 %vm472_vm3, %v544_v36  ;;  %v650_v38 = vmul.f32 %v1315_v21, %v1307_v20 }
 0x3e9   : > { %1206 = vmatpush3.bf16.msra.mxu0 %v661_v37  ;;  %1207 = vmatprep.mubr.msk.bf16.mxu0 %vm1429_vm0, %v1428_v1 }
 0x3ea   : > { %1211 = vmatprep.subr.bf16.mxu0 %v1428_v1  ;;  %1114 = vst.msk [vmem:[%s1657_s12 + $0x8] sm:$0xff] %vm472_vm3, %v650_v38  ;;  %v653_v42 = vpack.c.bf16 %v650_v38, %v650_v38 }
 0x3eb   : > { %v1317_v39 = vpop.eup %1316 }
 0x3ec   : > { %v869_v40 = vmul.f32 %v1317_v39, %v1309_v23 }
 0x3ee   : > { %1118 = vst.msk [vmem:[%s1657_s12 + $0x18] sm:$0xff] %vm472_vm3, %v869_v40  ;;  %v872_v50 = vpack.c.bf16 %v869_v40, %v869_v40 }
 0x3f0   : > { %1208 = vmatmul.mubr.msk.bf16.vlgmr.msra.gmra.mxu0 %vm472_vm3, %v653_v42 }
 0x3f1   : > { %1212 = vmatpush3.bf16.msra.mxu0 %v770_v43  ;;  %1213 = vmatprep.mubr.msk.bf16.mxu0 %vm1429_vm0, %v1428_v1 }
 0x3f2   : > { %1217 = vmatprep.subr.bf16.mxu0 %v1428_v1 }
 0x40a   : > { %v758_v44 = vpop.xlane.xlu1 %757 }
 0x40b   : > { %1318 = vrcp.f32 %v758_v44 }
 0x40e   : > { %v874_v47 = vpop.permute.xlu1 %873 }
 0x40f   : > { %v879_v49 = vsel %vm549_vm2, %v874_v47, 0 }
 0x418   : > { %v1319_v45 = vpop.eup %1318 }
 0x419   : > { %v760_v46 = vmul.f32 %v1319_v45, %v1311_v28 }
 0x41b   : > { %v763_v48 = vpack.c.bf16 %v760_v46, %v760_v46  ;;  %1116 = vst.msk [vmem:[%s1657_s12 + $0x10] sm:$0xff] %vm472_vm3, %v760_v46 }
 0x41d   : > { %1214 = vmatmul.mubr.msk.bf16.vlgmr.msra.gmra.mxu0 %vm472_vm3, %v763_v48 }
 0x41e   : > { %1218 = vmatpush3.bf16.msra.mxu0 %v879_v49  ;;  %1219 = vmatprep.mubr.msk.bf16.mxu0 %vm1429_vm0, %v1428_v1 }
 0x425   : > { %1220 = vmatmul.mubr.msk.bf16.vlgmr.msra.gmra.mxu0 %vm472_vm3, %v872_v50 }
 0x4a8   : > { %v587_v51 = vpop.f32.mrf.mxu0 }
 0x4aa   : > { %v1203_v52 = vpop.f32.mrf.mxu0 }
 0x4ac   : > { %v590_v53 = vpop.f32.mrf.mxu0 }
 0x4ae   : > { %v1204_v54 = vpop.f32.mrf.mxu0 }
 0x4b0   : > { %v697_v55 = vpop.f32.mrf.mxu0 }
 0x4b1   : > { %922 = vrot.lane.b32.xlu1 %v697_v55, %s1440_s30 }
 0x4b2   : > { %v1209_v56 = vpop.f32.mrf.mxu0 }
 0x4b4   : > { %v700_v57 = vpop.f32.mrf.mxu0 }
 0x4b6   : > { %v1210_v58 = vpop.f32.mrf.mxu0 }
 0x4dd   : > { %v806_v59 = vpop.f32.mrf.mxu0 }
 0x4de   : > { %926 = vrot.lane.b32.xlu0 %v806_v59, %s1439_s20  ;;  %s1324_s20 = sshll.u32 %s1441_s28, 4  ;;  %s1325_s20 = int_to_ptr.vmem [resolvable:$false] %s1324_s20 }
 0x4df   : > { %v1215_v1 = vpop.f32.mrf.mxu0  ;;  %s1326_s30 = scalar_lea.vmem %s1325_s20, 1024  ;;  %p1327_p1 = scmp.lt.s32.totalorder %s1686_s13, %s1325_s20 }
 0x4e0   : > { %p1328_p2 = scmp.lt.s32.totalorder %s1326_s30, %s1320_s27 }
 0x4e1   : > { %v809_v60 = vpop.f32.mrf.mxu0 }
 0x4e2   : > { %p1329_p3 = por %p1328_p2, %p1327_p1 }
 0x4e4   : > { %p1330_p5 = pnand %p1329_p3, %p1323_p0 }
 0x4e6   : > { %1333 = shalt.err (!%p1330_p5)
}
 0x4e7   : > { %s1334_s11 = scalar_lea.hbm %s1691_s18, 512  ;;  %s1338_s15 = scalar_lea.hbm %s1766_s6, 1024 }
 0x4e8   : > { %p1335_p6 = scmp.ne.s32.totalorder %s1691_s18, %s1334_s11  ;;  %p1339_p10 = scmp.lt.s32.totalorder %s1691_s18, %s1766_s6 }
 0x4e9   : > { %p1340_p11 = scmp.lt.s32.totalorder %s1338_s15, %s1334_s11 }
 0x4ea   : > { %p1336_p7 = pnand %p1335_p6, %p1520_p4 }
 0x4eb   : > { %p1341_p12 = por %p1340_p11, %p1339_p10 }
 0x4ec   : > { %p1337_p9 = pneg %p1336_p7 }
 0x4ee   : > { %p1342_p13 = pnand %p1341_p12, %p1337_p9 }
 0x4f0   : > { %1345 = shalt.err (!%p1342_p13)
}
 0x4f1   : > { %s1442_s27 = smov 128   ;;  %s1443_s20 = smov 8   ;;  %v1216_v61 = vpop.f32.mrf.mxu0  ;;  %vm933_vm5 = vcmask 261120   ;;  %vm935_vm6 = vcmask 523264   ;;  %vm937_vm7 = vcmask 785408  }
 0x4f2   : > { %1224 = dma.vmem_to_hbm [thread:$0]  (%p1520_p4), %s1686_s13, 512, %s1691_s18, %s953_s19, %s1442_s27, %s1442_s27, %s1443_s20  }
 0x4f3   : > { %v915_v62 = vpop.f32.mrf.mxu0  ;;  %s1108_s30 = sshll.u32 %s1654_s8, 3  ;;  %v1120_v6 = vld [vmem:[%s1764_s4] ss:$0 sm:$0xff]  ;;  %s1123_s13 = sshll.u32 %s1418_s24, 7 }
 0x4f4   : > { %930 = vrot.lane.b32.xlu1 %v915_v62, %s1438_s17  ;;  %s283_s18 = scalar_lea.vmem [#allocation4], %s1108_s30  ;;  %s965_s15 = scalar_lea.hbm %s1765_s5, %s1123_s13 }
 0x4f5   : > { %v1221_v63 = vpop.f32.mrf.mxu0  ;;  %s967_s19 = sshll.u32 %s283_s18, 4  ;;  %s948_s16 = scalar_lea.sflag [#allocation5], %s1654_s8  ;;  %s968_s19 = int_to_ptr.vmem [resolvable:$true] %s967_s19 }
 0x4f6   : > { %s1346_s28 = scalar_lea.vmem %s968_s19, 128  ;;  %s1444_s27 = smov [#allocation4]  }
 0x4f7   : > { %v918_v0 = vpop.f32.mrf.mxu0  ;;  %p1347_p0 = scmp.ne.s32.totalorder %s968_s19, %s1346_s28  ;;  %s1350_s24 = sshll.u32 %s1444_s27, 4  ;;  %s1351_s24 = int_to_ptr.vmem [resolvable:$false] %s1350_s24 }
 0x4f8   : > { %s1352_s20 = scalar_lea.vmem %s1351_s24, 256  ;;  %p1353_p3 = scmp.lt.s32.totalorder %s968_s19, %s1351_s24 }
 0x4f9   : > { %v1222_v2 = vpop.f32.mrf.mxu0  ;;  %p1348_p1 = pnand %p1347_p0, %p1520_p4  ;;  %p1354_p5 = scmp.lt.s32.totalorder %s1352_s20, %s1346_s28 }
 0x4fb   : > { %p1349_p2 = pneg %p1348_p1  ;;  %p1355_p6 = por %p1354_p5, %p1353_p3 }
 0x4fd   : > { %p1356_p7 = pnand %p1355_p6, %p1349_p2 }
 0x523   : > { %v923_v3 = vpop.permute.xlu1 %922 }
 0x524   : > { %v934_v5 = vsel %vm933_vm5, %v587_v51, %v923_v3 }
 0x550   : > { %v927_v4 = vpop.permute.xlu0 %926 }
 0x551   : > { %v936_v7 = vsel %vm935_vm6, %v934_v5, %v927_v4 }
 0x566   : > { %v931_v8 = vpop.permute.xlu1 %930 }
 0x567   : > { %v938_v9 = vsel %vm937_vm7, %v936_v7, %v931_v8 }
 0x568   : > { %v945_v10 = vadd.f32 %v1120_v6, %v938_v9 }
 0x56a   : > { %946 = vst [vmem:[%s283_s18] sm:$0xff] %v945_v10 }
 0x56b   : > { %1359 = shalt.err (!%p1356_p7)
}
 0x56c   : > { %s1360_s30 = scalar_lea.hbm %s965_s15, 128  ;;  %s1364_s12 = scalar_lea.hbm %s1765_s5, 256 }
 0x56d   : > { %p1361_p9 = scmp.ne.s32.totalorder %s965_s15, %s1360_s30  ;;  %p1365_p12 = scmp.lt.s32.totalorder %s965_s15, %s1765_s5 }
 0x56e   : > { %p1366_p13 = scmp.lt.s32.totalorder %s1364_s12, %s1360_s30 }
 0x56f   : > { %p1362_p10 = pnand %p1361_p9, %p1520_p4 }
 0x570   : > { %p1367_p0 = por %p1366_p13, %p1365_p12 }
 0x571   : > { %p1363_p11 = pneg %p1362_p10 }
 0x573   : > { %p1368_p1 = pnand %p1367_p0, %p1363_p11 }
 0x575   : > { %1371 = shalt.err (!%p1368_p1)
}
 0x576   : > { %1223 = dma.vmem_to_hbm [thread:$0]  (%p1520_p4), %s968_s19, 128, %s965_s15, %s948_s16  }
 0x577 PF: > { %p1234_p2 = scmp.ge.s32.totalorder %s1426_s26, 2  ;;  %s996_s17 = sand.u32 1, %s1406_s21  }
 0x578   : > { %s997_s14 = scalar_lea.sflag [#allocation5], %s996_s17 }
 0x579   : > { %p1228_p3 = pnand %p1234_p2, %p1527_p8 }
 0x57b   : > { %p1229_p5 = pneg %p1228_p3 }
 0x57d   : > { %1397 = dma.done.wait (%p1229_p5), %s997_s14, 128  }
 0x57e   : > { %1399 = vsyncadd (%p1229_p5), %s997_s14, 4294967168  ;;  %s1006_s28 = scalar_lea.sflag [#allocation7], %s996_s17 }
 0x57f   : > { %1401 = dma.done.wait (%p1229_p5), %s1006_s28, 512  }
 0x580   : > { %1403 = vsyncadd (%p1229_p5), %s1006_s28, 4294966784  ;;  %s23_s26 = sadd.s32 1, %s1426_s26   ;;  %s1769_s21 = smov %s1410_s22 }
 0x581   : > { %p20_p6 = scmp.ge.s32.totalorder %s23_s26, 4   ;;  %s1770_s22 = smov %s1414_s23 }
 0x582   : > { %s1771_s23 = smov %s1533_s10  ;;  %s1772_s24 = smov %s1422_s25 }
 0x583   : > { %s1773_s25 = smov %s1775_s29  ;;  %22 = sbr.rel (!%p20_p6) target bundleno = 6 (0x6), region = 103 }
 0x588   :  { %1011 = vsyncpa [#allocation5], 1 }
 0x589   :  { %1013 = vsyncpa [#allocation5 + $0x1], 1 }
 0x58a   :  { %1014 = vsyncpa [#allocation7], 1 }
 0x58b   :  { %1016 = vsyncpa [#allocation7 + $0x1], 1 }

</bundles_post_ra>
